<compile_context>
chip_gen: v5e
topology: v5e:2x2
jax: 0.10.0
libtpu: 0.0.40
codegen_flags: <defaults>
</compile_context>

<pallas_src>
import functools

import jax
import jax.numpy as jnp
from jax.experimental import pallas as pl
from jax.experimental.pallas import tpu as pltpu


def _int_pow(x, n):
    """x ** n for a static integer n >= 1 using only VPU multiplies."""
    acc = None
    base = x
    while n > 0:
        if n & 1:
            acc = base if acc is None else acc * base
        n >>= 1
        if n:
            base = base * base
    return acc


def _gem_kernel(*refs, eps, inv_hw, static_p, h_total, h_block, needs_h_mask):
    """refs = ([p_ref SMEM], x_ref (RB,Hc,W), o_ref (RB,1), acc_ref (RB,W) f32)."""
    if static_p is None:
        p_ref, x_ref, o_ref, acc_ref = refs
        p = p_ref[0]
    else:
        x_ref, o_ref, acc_ref = refs
        p = None

    k = pl.program_id(1)

    @pl.when(k == 0)
    def _init():
        acc_ref[...] = jnp.zeros_like(acc_ref)

    x = x_ref[...].astype(jnp.float32)        # (RB, Hc, W)
    x = jnp.maximum(x, eps)                   # clamp(min=eps)  ->  x > 0

    if static_p is None:
        # x ** p == exp(p * log(x)) for x > 0 (EUP path); avoids jnp.power's
        # extra sign/NaN select filler on the VPU.
        xp = jnp.exp(p * jnp.log(x))
    else:
        sp = float(static_p)
        if sp == round(sp) and 1 <= int(round(sp)) <= 16:
            xp = _int_pow(x, int(round(sp)))            # pure-VPU fast path
        else:
            xp = jnp.exp(sp * jnp.log(x))

    if needs_h_mask:
        # Tail H chunk: zero out-of-range rows so garbage never reaches the
        # accumulator (2-D iota, broadcast over the row axis).
        h_idx = jax.lax.broadcasted_iota(jnp.int32, (xp.shape[1], xp.shape[2]), 0)
        valid = h_idx < (h_total - k * h_block)
        xp = jnp.where(valid[None], xp, 0.0)

    # Per-lane partial sums: reduce over the H chunk only; the cross-lane
    # reduce and the narrow (RB, 1) store are deferred to the finalize step.
    acc_ref[...] += jnp.sum(xp, axis=1)

    @pl.when(k == pl.num_programs(1) - 1)
    def _finalize():
        s = jnp.sum(acc_ref[...], axis=-1, keepdims=True)    # (RB, 1)
        mean = s * inv_hw                                     # > 0 (>= eps^p)
        inv_p = (1.0 / p) if static_p is None else (1.0 / float(static_p))
        o_ref[...] = jnp.exp(jnp.log(mean) * inv_p).astype(o_ref.dtype)


def _default_vmem_budget_bytes():
    """Generation-aware budget for the double-buffered x stream."""
    try:
        cap = int(pltpu.get_tpu_info().vmem_capacity_bytes)
    except Exception:
        cap = 64 * 1024 * 1024            # conservative (v7x-sized VMEM)
    # ~1/4 of physical VMEM: ~32 MiB on 128-MiB v5e/v6e, ~16 MiB on 64-MiB v7x.
    return max(cap // 4, 8 * 1024 * 1024)


def gem(x, p, eps=1e-6, *, row_block=None, h_block=None, vmem_budget_bytes=None):
    """GeM pooling.  x: (N, C, H, W).  p: Python number (static fast path) or a
    shape-(1,) array (learnable parameter).  Returns (N, C, 1, 1)."""
    N, C, H, W = x.shape
    rows, hw = N * C, H * W
    xr = x.reshape(rows, H, W)            # merge leading dims only: layout-free
    itemsize = jnp.dtype(x.dtype).itemsize
    sublane = {4: 8, 2: 16, 1: 32}.get(itemsize, 8)

    static_p = float(p) if isinstance(p, (int, float)) else None

    if vmem_budget_bytes is None:
        vmem_budget_bytes = _default_vmem_budget_bytes()

    nbuf = 2                                   # double-buffered x stream
    w_pad = -(-W // 128) * 128                 # lane padding of the VMEM tile

    # ---- H chunking: only when even a minimal (sublane-row) tile would blow
    # the budget; the tail chunk is masked inside the kernel. ----------------
    if h_block is None:
        h_pad = -(-H // sublane) * sublane
        if nbuf * sublane * h_pad * w_pad * itemsize <= vmem_budget_bytes:
            h_block = H
        else:
            h_block = vmem_budget_bytes // (nbuf * sublane * w_pad * itemsize)
            h_block = max(sublane, (h_block // sublane) * sublane)
            h_block = min(h_block, H)
    else:
        h_block = min(int(h_block), H)
        if h_block != H and h_block % sublane != 0:
            raise ValueError("h_block must equal H or be a multiple of the "
                             f"sublane tile ({sublane}) for this dtype")
    needs_h_mask = (H % h_block) != 0

    # ---- row block: fill the VMEM budget (padded-tile accounting). ---------
    per_row_vmem = (-(-h_block // sublane) * sublane) * w_pad * itemsize
    rows_aligned = -(-rows // sublane) * sublane
    if row_block is None:
        rb = vmem_budget_bytes // (nbuf * per_row_vmem)
        rb = max(sublane, (rb // sublane) * sublane)
        row_block = min(rb, rows_aligned)
    else:
        row_block = min(max(sublane, (int(row_block) // sublane) * sublane),
                        rows_aligned)

    grid = (pl.cdiv(rows, row_block), pl.cdiv(H, h_block))

    kernel = functools.partial(
        _gem_kernel, eps=float(eps), inv_hw=1.0 / float(hw), static_p=static_p,
        h_total=H, h_block=h_block, needs_h_mask=needs_h_mask)

    in_specs = [pl.BlockSpec((row_block, h_block, W), lambda i, k: (i, k, 0))]
    args = [xr]
    if static_p is None:
        in_specs = [pl.BlockSpec(memory_space=pltpu.SMEM)] + in_specs
        args = [jnp.asarray(p, dtype=jnp.float32).reshape((1,))] + args

    transcendentals = (0 if (static_p is not None and static_p == round(static_p))
                       else 2 * rows * hw)
    cost = pl.CostEstimate(
        flops=5 * rows * hw,
        transcendentals=transcendentals,
        bytes_accessed=rows * hw * itemsize + rows * itemsize,
    )

    out = pl.pallas_call(
        kernel,
        out_shape=jax.ShapeDtypeStruct((rows, 1), x.dtype),
        grid=grid,
        in_specs=in_specs,
        out_specs=pl.BlockSpec((row_block, 1), lambda i, k: (i, 0)),
        scratch_shapes=[pltpu.VMEM((row_block, W), jnp.float32)],
        compiler_params=pltpu.CompilerParams(
            dimension_semantics=("parallel", "arbitrary"),
            vmem_limit_bytes=int(vmem_budget_bytes) + (8 << 20),
        ),
        cost_estimate=cost,
    )(*args)

    # TODO(synk): for very small spatial maps a channels-on-lanes layout
    # ((N, H*W, C) input) would recover full lane width; that is an upstream
    # layout decision, not handled here.
    return out.reshape(N, C, 1, 1)


def _gem_ref(x, p, eps):
    m = jnp.mean(jnp.power(jnp.maximum(x, eps), p), axis=(-2, -1), keepdims=True)
    return jnp.power(m, 1.0 / p)


if __name__ == "__main__":
    k0, k1 = jax.random.split(jax.random.PRNGKey(0))
    eps = 1e-6
    p_param = jnp.ones((1,), dtype=jnp.float32) * 3.0   # nn.Parameter(ones(1)*3)

    # 1) canonical shape, dynamic (learnable) p — matches the nn.Module.
    N, C, H, W = 2, 4, 16, 16
    x = jax.random.normal(k0, (N, C, H, W), dtype=jnp.float32)
    y = gem(x, p_param, eps)
    jax.block_until_ready(y)
    ref = _gem_ref(x, p_param[0], eps)
    assert y.shape == (N, C, 1, 1)
    assert jnp.allclose(y, ref, rtol=1e-4, atol=1e-6), "dynamic-p mismatch"

    # 2) static-p fast path (p known at trace time -> repeated VPU multiply).
    y_static = gem(x, 3, eps)
    jax.block_until_ready(y_static)
    assert jnp.allclose(y_static, ref, rtol=1e-4, atol=1e-6), "static-p mismatch"

    # 3) H-chunked path with masked tail (h_block does not divide H).
    x2 = jax.random.normal(k1, (2, 4, 20, 16), dtype=jnp.float32)
    y2 = gem(x2, p_param, eps, h_block=16)
    jax.block_until_ready(y2)
    ref2 = _gem_ref(x2, p_param[0], eps)
    assert y2.shape == (2, 4, 1, 1)
    assert jnp.allclose(y2, ref2, rtol=1e-4, atol=1e-6), "chunked-H mismatch"

    print("KERNEL_OK")
</pallas_src>

<mosaic_0001>
module attributes {stable_mosaic.version = 11 : i64} {
  func.func @_gem_kernel(%arg0: i32, %arg1: i32, %arg2: memref<1xf32, #tpu.memory_space<smem>>, %arg3: memref<8x16x16xf32, #tpu.memory_space<vmem>>, %arg4: memref<8x1xf32, #tpu.memory_space<vmem>>, %arg5: memref<8x16xf32, #tpu.memory_space<vmem>>) attributes {dimension_semantics = [#tpu.dimension_semantics<parallel>, #tpu.dimension_semantics<arbitrary>], iteration_bounds = array<i64: 1, 1>, scalar_prefetch = 0 : i64, scratch_operands = 1 : i64, tpu.core_type = #tpu.core_type<tc>, window_params = [{transform_indices = @transform_0, window_bounds = array<i64: 1>}, {transform_indices = @transform_1, window_bounds = array<i64: 8, 16, 16>}, {transform_indices = @transform_2, window_bounds = array<i64: 8, 1>}]} {
    %c0 = arith.constant 0 : index
    %0 = memref.load %arg2[%c0] : memref<1xf32, #tpu.memory_space<smem>>
    %c0_i32 = arith.constant 0 : i32
    %1 = arith.cmpi eq, %arg1, %c0_i32 : i32
    %2 = arith.extui %1 : i1 to i32
    %c0_i32_0 = arith.constant 0 : i32
    %3 = arith.cmpi ne, %2, %c0_i32_0 : i32
    scf.if %3 {
      %cst_11 = arith.constant 0.000000e+00 : f32
      %18 = vector.broadcast %cst_11 : f32 to vector<8x16xf32>
      %c0_12 = arith.constant 0 : index
      %c0_13 = arith.constant 0 : index
      %19 = vector.load %arg5[%c0_12, %c0_13] : memref<8x16xf32, #tpu.memory_space<vmem>>, vector<8x16xf32>
      tpu.vector_store %arg5[%c0_12, %c0_13], %18 {strides = array<i32>} : memref<8x16xf32, #tpu.memory_space<vmem>>, vector<8x16xf32>,
    } else {
    }
    %c0_1 = arith.constant 0 : index
    %c0_2 = arith.constant 0 : index
    %c0_3 = arith.constant 0 : index
    %4 = vector.load %arg3[%c0_1, %c0_2, %c0_3] : memref<8x16x16xf32, #tpu.memory_space<vmem>>, vector<8x16x16xf32>
    %cst = arith.constant 9.99999997E-7 : f32
    %5 = vector.broadcast %cst : f32 to vector<8x16x16xf32>
    %6 = arith.maximumf %4, %5 : vector<8x16x16xf32>
    %7 = math.log %6 : vector<8x16x16xf32>
    %8 = vector.broadcast %0 : f32 to vector<8x16x16xf32>
    %9 = arith.mulf %8, %7 : vector<8x16x16xf32>
    %10 = math.exp %9 : vector<8x16x16xf32>
    %c0_4 = arith.constant 0 : index
    %c0_5 = arith.constant 0 : index
    %11 = vector.load %arg5[%c0_4, %c0_5] : memref<8x16xf32, #tpu.memory_space<vmem>>, vector<8x16xf32>
    %cst_6 = arith.constant dense<0.000000e+00> : vector<8x16xf32>
    %12 = vector.multi_reduction <add>, %10, %cst_6 [1] : vector<8x16x16xf32> to vector<8x16xf32>
    %13 = arith.addf %11, %12 : vector<8x16xf32>
    %c0_7 = arith.constant 0 : index
    %c0_8 = arith.constant 0 : index
    %14 = vector.load %arg5[%c0_7, %c0_8] : memref<8x16xf32, #tpu.memory_space<vmem>>, vector<8x16xf32>
    tpu.vector_store %arg5[%c0_7, %c0_8], %13 {strides = array<i32>} : memref<8x16xf32, #tpu.memory_space<vmem>>, vector<8x16xf32>,
    %c0_i32_9 = arith.constant 0 : i32
    %15 = arith.cmpi eq, %arg1, %c0_i32_9 : i32
    %16 = arith.extui %15 : i1 to i32
    %c0_i32_10 = arith.constant 0 : i32
    %17 = arith.cmpi ne, %16, %c0_i32_10 : i32
    scf.if %17 {
      %c0_11 = arith.constant 0 : index
      %c0_12 = arith.constant 0 : index
      %18 = vector.load %arg5[%c0_11, %c0_12] : memref<8x16xf32, #tpu.memory_space<vmem>>, vector<8x16xf32>
      %cst_13 = arith.constant dense<0.000000e+00> : vector<8xf32>
      %19 = vector.multi_reduction <add>, %18, %cst_13 [1] : vector<8x16xf32> to vector<8xf32>
      %20 = vector.shape_cast %19 : vector<8xf32> to vector<8x1xf32>
      %cst_14 = arith.constant 3.906250e-03 : f32
      %21 = vector.broadcast %cst_14 : f32 to vector<8x1xf32>
      %22 = arith.mulf %20, %21 : vector<8x1xf32>
      %cst_15 = arith.constant 1.000000e+00 : f32
      %23 = arith.divf %cst_15, %0 : f32
      %24 = math.log %22 : vector<8x1xf32>
      %25 = vector.broadcast %23 : f32 to vector<8x1xf32>
      %26 = arith.mulf %24, %25 : vector<8x1xf32>
      %27 = math.exp %26 : vector<8x1xf32>
      %c0_16 = arith.constant 0 : index
      %c0_17 = arith.constant 0 : index
      %28 = vector.load %arg4[%c0_16, %c0_17] : memref<8x1xf32, #tpu.memory_space<vmem>>, vector<8x1xf32>
      tpu.vector_store %arg4[%c0_16, %c0_17], %27 {strides = array<i32>} : memref<8x1xf32, #tpu.memory_space<vmem>>, vector<8x1xf32>,
    } else {
    }
    return
  }
  func.func @transform_0(%arg0: i32, %arg1: i32) -> i32 {
    %c0_i32 = arith.constant 0 : i32
    %c0_i32_0 = arith.constant 0 : i32
    return %c0_i32 : i32
  }
  func.func @transform_1(%arg0: i32, %arg1: i32) -> (i32, i32, i32) {
    %c0_i32 = arith.constant 0 : i32
    %c0_i32_0 = arith.constant 0 : i32
    return %arg0, %arg1, %c0_i32 : i32, i32, i32
  }
  func.func @transform_2(%arg0: i32, %arg1: i32) -> (i32, i32) {
    %c0_i32 = arith.constant 0 : i32
    %c0_i32_0 = arith.constant 0 : i32
    return %arg0, %c0_i32 : i32, i32
  }
}

</mosaic_0001>

<bundles_post_ra>
// kernel: tpu_custom_call.1
= control target key start
LH: loop header
LB: loop body
LE: loop exit
PB: predicated region body
PF: predicated region fallthrough
CT: control target
= control target key end

     0   :  { %8 = vsyncpa [#allocation5], 0  ;;  %s386_s12 = smov [#allocation4]   ;;  %s387_s14 = smov 128   ;;  %s459_s0 = inlined_call_operand.<no memory space> [shape: f32[1], index: 0, kind: input, shape index: {}]   ;;  %s460_s1 = inlined_call_operand.hbm [shape: f32[8,16,16], index: 1, kind: input, shape index: {}]   ;;  %s461_s2 = inlined_call_operand.vmem [shape: f32[8,1], index: 2, kind: output, shape index: {}]  }
   0x1   :  { %s15_s11 = sshll.u32 %s460_s1, 4  ;;  %s17_s13 = sshll.u32 %s386_s12, 4  ;;  %s16_s11 = int_to_ptr.hbm [resolvable:$true] %s15_s11  ;;  %s18_s13 = int_to_ptr.vmem [resolvable:$true] %s17_s13 }
   0x2   :  { %s388_s15 = smov 8  }
   0x3   :  { %23 = dma.hbm_to_vmem [thread:$0]  %s16_s11, 2048, %s18_s13, [#allocation5], %s387_s14, %s387_s14, %s388_s15  }
   0x4   :  { %384 = dma.done.wait [#allocation5], 2048  }
   0x5   :  { %385 = vsyncadd [#allocation5], 4294965248  ;;  %vm33_vm0 = vcmask 130048   ;;  %v389_v0 = vmov 0.0   ;;  %v35_v1 = vld [vmem:[#allocation4] sm:$0xff]  ;;  %v36_v2 = vld [vmem:[#allocation4 + $0x8] sm:$0xff]  ;;  %v412_v27 = vstv %s459_s0 }
   0x6   :  { %34 = vst.msk [vmem:[#allocation2] sm:$0xff] %vm33_vm0, %v389_v0  ;;  %v37_v3 = vld [vmem:[#allocation4 + $0x10] sm:$0xff]  ;;  %v38_v4 = vld [vmem:[#allocation4 + $0x18] sm:$0xff]  ;;  %v51_v5 = vmax.f32 %v35_v1, 1e-06  ;;  %v39_v6 = vld [vmem:[#allocation4 + $0x20] sm:$0xff]  ;;  %vm261_vm8 = vweird.f32 %v412_v27 }
   0x7   :  { %v40_v7 = vld [vmem:[#allocation4 + $0x28] sm:$0xff]  ;;  %v52_v8 = vmax.f32 %v36_v2, 1e-06  ;;  %v41_v9 = vld [vmem:[#allocation4 + $0x30] sm:$0xff]  ;;  %v42_v10 = vld [vmem:[#allocation4 + $0x38] sm:$0xff]  ;;  %vm230_vm1 = vcmask 1041409  }
   0x8   :  { %v53_v11 = vmax.f32 %v37_v3, 1e-06  ;;  %290 = vlog2.f32 %v51_v5  ;;  %v43_v12 = vld [vmem:[#allocation4 + $0x40] sm:$0xff]  ;;  %v54_v13 = vmax.f32 %v38_v4, 1e-06  ;;  %v44_v14 = vld [vmem:[#allocation4 + $0x48] sm:$0xff] }
   0x9   :  { %292 = vlog2.f32 %v52_v8  ;;  %v55_v15 = vmax.f32 %v39_v6, 1e-06  ;;  %v56_v16 = vmax.f32 %v40_v7, 1e-06  ;;  %v45_v17 = vld [vmem:[#allocation4 + $0x50] sm:$0xff]  ;;  %v46_v20 = vld [vmem:[#allocation4 + $0x58] sm:$0xff] }
   0xa   :  { %294 = vlog2.f32 %v53_v11  ;;  %v57_v18 = vmax.f32 %v41_v9, 1e-06  ;;  %v58_v19 = vmax.f32 %v42_v10, 1e-06  ;;  %v59_v21 = vmax.f32 %v43_v12, 1e-06 }
   0xb   :  { %296 = vlog2.f32 %v54_v13  ;;  %v47_v22 = vld [vmem:[#allocation4 + $0x60] sm:$0xff]  ;;  %v60_v23 = vmax.f32 %v44_v14, 1e-06  ;;  %v48_v25 = vld [vmem:[#allocation4 + $0x68] sm:$0xff]  ;;  %v61_v26 = vmax.f32 %v45_v17, 1e-06 }
   0xc   :  { %298 = vlog2.f32 %v55_v15  ;;  %v49_v29 = vld [vmem:[#allocation4 + $0x70] sm:$0xff]  ;;  %v62_v30 = vmax.f32 %v46_v20, 1e-06  ;;  %v50_v33 = vld [vmem:[#allocation4 + $0x78] sm:$0xff]  ;;  %v63_v34 = vmax.f32 %v47_v22, 1e-06 }
   0xd   :  { %300 = vlog2.f32 %v56_v16  ;;  %v64_v37 = vmax.f32 %v48_v25, 1e-06  ;;  %v65_v41 = vmax.f32 %v49_v29, 1e-06  ;;  %v66_v45 = vmax.f32 %v50_v33, 1e-06 }
   0xe   :  { %v291_v24 = vpop.eup %290  ;;  %302 = vlog2.f32 %v57_v18  ;;  %vm232_vm2 = vcmask 1042434   ;;  %vm234_vm3 = vcmask 1043459   ;;  %vm236_vm4 = vcmask 1044484  }
   0xf   :  { %v293_v28 = vpop.eup %292  ;;  %v68_v31 = vmul.f32 0.6931472, %v291_v24  ;;  %304 = vlog2.f32 %v58_v19  ;;  %vm238_vm5 = vcmask 1045509   ;;  %vm240_vm6 = vcmask 1046534  }
  0x10   :  { %v295_v32 = vpop.eup %294  ;;  %v70_v35 = vmul.f32 0.6931472, %v293_v28  ;;  %306 = vlog2.f32 %v59_v21  ;;  %vm242_vm7 = vcmask 1047559   ;;  %vm277_vm12 = vcmask 7168  }
  0x11   :  { %v297_v36 = vpop.eup %296  ;;  %v72_v38 = vmul.f32 0.6931472, %v295_v32  ;;  %308 = vlog2.f32 %v60_v23  ;;  %v100_v39 = vmul.f32 %v412_v27, %v68_v31 }
  0x12   :  { %v299_v40 = vpop.eup %298  ;;  %v74_v42 = vmul.f32 0.6931472, %v297_v36  ;;  %310 = vlog2.f32 %v61_v26  ;;  %v101_v43 = vmul.f32 %v412_v27, %v70_v35 }
  0x13   :  { %v301_v44 = vpop.eup %300  ;;  %v76_v46 = vmul.f32 0.6931472, %v299_v40  ;;  %312 = vlog2.f32 %v62_v30  ;;  %v102_v47 = vmul.f32 %v412_v27, %v72_v38  ;;  %v116_v51 = vmul.f32 1.442695, %v100_v39 }
  0x14   :  { %v303_v48 = vpop.eup %302  ;;  %v78_v49 = vmul.f32 0.6931472, %v301_v44  ;;  %314 = vlog2.f32 %v63_v34  ;;  %v103_v50 = vmul.f32 %v412_v27, %v74_v42  ;;  %v118_v55 = vmul.f32 1.442695, %v101_v43 }
  0x15   :  { %v305_v52 = vpop.eup %304  ;;  %v80_v53 = vmul.f32 0.6931472, %v303_v48  ;;  %316 = vlog2.f32 %v64_v37  ;;  %v104_v54 = vmul.f32 %v412_v27, %v76_v46  ;;  %v120_v59 = vmul.f32 1.442695, %v102_v47 }
  0x16   :  { %v307_v56 = vpop.eup %306  ;;  %v82_v57 = vmul.f32 0.6931472, %v305_v52  ;;  %318 = vlog2.f32 %v65_v41  ;;  %v105_v58 = vmul.f32 %v412_v27, %v78_v49  ;;  %v122_v63 = vmul.f32 1.442695, %v103_v50 }
  0x17   :  { %v309_v60 = vpop.eup %308  ;;  %v84_v61 = vmul.f32 0.6931472, %v307_v56  ;;  %320 = vlog2.f32 %v66_v45  ;;  %v106_v62 = vmul.f32 %v412_v27, %v80_v53  ;;  %v124_v3 = vmul.f32 1.442695, %v104_v54 }
  0x18   :  { %v311_v0 = vpop.eup %310  ;;  %v86_v1 = vmul.f32 0.6931472, %v309_v60  ;;  %v107_v2 = vmul.f32 %v412_v27, %v82_v57  ;;  %322 = vpow2.f32 %v116_v51  ;;  %v126_v7 = vmul.f32 1.442695, %v105_v58 }
  0x19   :  { %v313_v4 = vpop.eup %312  ;;  %v88_v5 = vmul.f32 0.6931472, %v311_v0  ;;  %v108_v6 = vmul.f32 %v412_v27, %v84_v61  ;;  %324 = vpow2.f32 %v118_v55  ;;  %v128_v11 = vmul.f32 1.442695, %v106_v62 }
  0x1a   :  { %v315_v8 = vpop.eup %314  ;;  %v90_v9 = vmul.f32 0.6931472, %v313_v4  ;;  %v109_v10 = vmul.f32 %v412_v27, %v86_v1  ;;  %326 = vpow2.f32 %v120_v59  ;;  %v130_v15 = vmul.f32 1.442695, %v107_v2 }
  0x1b   :  { %v317_v12 = vpop.eup %316  ;;  %v92_v13 = vmul.f32 0.6931472, %v315_v8  ;;  %v110_v14 = vmul.f32 %v412_v27, %v88_v5  ;;  %328 = vpow2.f32 %v122_v63  ;;  %v132_v19 = vmul.f32 1.442695, %v108_v6 }
  0x1c   :  { %v319_v16 = vpop.eup %318  ;;  %v94_v17 = vmul.f32 0.6931472, %v317_v12  ;;  %v111_v18 = vmul.f32 %v412_v27, %v90_v9  ;;  %330 = vpow2.f32 %v124_v3  ;;  %v134_v23 = vmul.f32 1.442695, %v109_v10 }
  0x1d   :  { %v321_v20 = vpop.eup %320  ;;  %v96_v21 = vmul.f32 0.6931472, %v319_v16  ;;  %v112_v22 = vmul.f32 %v412_v27, %v92_v13  ;;  %332 = vpow2.f32 %v126_v7  ;;  %v136_v28 = vmul.f32 1.442695, %v110_v14 }
  0x1e   :  { %v323_v24 = vpop.eup %322  ;;  %v98_v25 = vmul.f32 0.6931472, %v321_v20  ;;  %v113_v26 = vmul.f32 %v412_v27, %v94_v17  ;;  %334 = vpow2.f32 %v128_v11  ;;  %v138_v31 = vmul.f32 1.442695, %v111_v18 }
  0x1f   :  { %v325_v29 = vpop.eup %324  ;;  %v114_v30 = vmul.f32 %v412_v27, %v96_v21  ;;  %336 = vpow2.f32 %v130_v15  ;;  %v150_v32 = vsel %vm33_vm0, %v323_v24, 0.0  ;;  %v140_v35 = vmul.f32 1.442695, %v112_v22 }
  0x20   :  { %v327_v33 = vpop.eup %326  ;;  %v115_v34 = vmul.f32 %v412_v27, %v98_v25  ;;  %338 = vpow2.f32 %v132_v19  ;;  %v151_v36 = vsel %vm33_vm0, %v325_v29, 0.0  ;;  %v142_v38 = vmul.f32 1.442695, %v113_v26 }
  0x21   :  { %v329_v37 = vpop.eup %328  ;;  %340 = vpow2.f32 %v134_v23  ;;  %v152_v39 = vadd.f32 %v151_v36, %v150_v32  ;;  %v159_v40 = vsel %vm33_vm0, %v327_v33, 0.0  ;;  %v144_v42 = vmul.f32 1.442695, %v114_v30 }
  0x22   :  { %v331_v41 = vpop.eup %330  ;;  %342 = vpow2.f32 %v136_v28  ;;  %v146_v43 = vmul.f32 1.442695, %v115_v34  ;;  %v160_v44 = vsel %vm33_vm0, %v329_v37, 0.0 }
  0x23   :  { %v333_v45 = vpop.eup %332  ;;  %344 = vpow2.f32 %v138_v31  ;;  %v153_v46 = vrot.slane %v152_v39, 4  ;;  %v161_v47 = vadd.f32 %v160_v44, %v159_v40  ;;  %v168_v48 = vsel %vm33_vm0, %v331_v41, 0.0 }
  0x24   :  { %v335_v49 = vpop.eup %334  ;;  %346 = vpow2.f32 %v140_v35  ;;  %v169_v50 = vsel %vm33_vm0, %v333_v45, 0.0 }
  0x25   :  { %v337_v51 = vpop.eup %336  ;;  %348 = vpow2.f32 %v142_v38  ;;  %v154_v52 = vadd.f32 %v153_v46, %v152_v39  ;;  %v162_v53 = vrot.slane %v161_v47, 4  ;;  %v170_v54 = vadd.f32 %v169_v50, %v168_v48 }
  0x26   :  { %v339_v55 = vpop.eup %338  ;;  %350 = vpow2.f32 %v144_v42  ;;  %v177_v56 = vsel %vm33_vm0, %v335_v49, 0.0  ;;  %v178_v57 = vsel %vm33_vm0, %v337_v51, 0.0 }
  0x27   :  { %v341_v58 = vpop.eup %340  ;;  %352 = vpow2.f32 %v146_v43  ;;  %v155_v59 = vrot.slane %v154_v52, 2  ;;  %v163_v60 = vadd.f32 %v162_v53, %v161_v47  ;;  %v171_v61 = vrot.slane %v170_v54, 4 }
  0x28   :  { %v343_v62 = vpop.eup %342  ;;  %v179_v63 = vadd.f32 %v178_v57, %v177_v56  ;;  %v186_v0 = vsel %vm33_vm0, %v339_v55, 0.0  ;;  %v187_v1 = vsel %vm33_vm0, %v341_v58, 0.0  ;;  %354 = vrcp.f32 %v412_v27 }
  0x29   :  { %v345_v2 = vpop.eup %344  ;;  %v156_v3 = vadd.f32 %v155_v59, %v154_v52  ;;  %v164_v4 = vrot.slane %v163_v60, 2  ;;  %v172_v5 = vadd.f32 %v171_v61, %v170_v54  ;;  %v188_v6 = vadd.f32 %v187_v1, %v186_v0 }
  0x2a   :  { %v347_v7 = vpop.eup %346  ;;  %v180_v8 = vrot.slane %v179_v63, 4  ;;  %v195_v9 = vsel %vm33_vm0, %v343_v62, 0.0  ;;  %v196_v10 = vsel %vm33_vm0, %v345_v2, 0.0  ;;  %v265_v2 = vand.u32 2147483647, %v412_v27 }
  0x2b   :  { %v349_v11 = vpop.eup %348  ;;  %v157_v12 = vrot.slane %v156_v3, 1  ;;  %v165_v13 = vadd.f32 %v164_v4, %v163_v60  ;;  %v173_v14 = vrot.slane %v172_v5, 2  ;;  %v189_v15 = vrot.slane %v188_v6, 4  ;;  %v148_v4 = vld [vmem:[#allocation2] sm:$0xff] }
  0x2c   :  { %v351_v16 = vpop.eup %350  ;;  %v181_v17 = vadd.f32 %v180_v8, %v179_v63  ;;  %v197_v18 = vadd.f32 %v196_v10, %v195_v9  ;;  %v204_v19 = vsel %vm33_vm0, %v347_v7, 0.0  ;;  %v205_v20 = vsel %vm33_vm0, %v349_v11, 0.0 }
  0x2d   :  { %v353_v21 = vpop.eup %352  ;;  %v158_v22 = vadd.f32 %v157_v12, %v156_v3  ;;  %v166_v23 = vrot.slane %v165_v13, 1  ;;  %v174_v24 = vadd.f32 %v173_v14, %v172_v5  ;;  %v190_v25 = vadd.f32 %v189_v15, %v188_v6 }
  0x2e   :  { %v182_v26 = vrot.slane %v181_v17, 2  ;;  %v198_v28 = vrot.slane %v197_v18, 4  ;;  %v206_v29 = vadd.f32 %v205_v20, %v204_v19  ;;  %v213_v30 = vsel %vm33_vm0, %v351_v16, 0.0  ;;  %v355_v61 = vpop.eup %354 }
  0x2f   :  { %v167_v31 = vadd.f32 %v166_v23, %v165_v13  ;;  %v175_v32 = vrot.slane %v174_v24, 1  ;;  %v191_v33 = vrot.slane %v190_v25, 2  ;;  %v214_v34 = vsel %vm33_vm0, %v353_v21, 0.0 }
  0x30   :  { %v183_v35 = vadd.f32 %v182_v26, %v181_v17  ;;  %v199_v36 = vadd.f32 %v198_v28, %v197_v18  ;;  %v207_v37 = vrot.slane %v206_v29, 4  ;;  %v215_v38 = vadd.f32 %v214_v34, %v213_v30 }
  0x31   :  { %v176_v39 = vadd.f32 %v175_v32, %v174_v24  ;;  %v192_v40 = vadd.f32 %v191_v33, %v190_v25  ;;  %v231_v41 = vsel %vm230_vm1, %v167_v31, %v158_v22  ;;  %v257_v1 = vmul.f32 %v355_v61, %v412_v27 }
  0x32   :  { %v184_v42 = vrot.slane %v183_v35, 1  ;;  %v200_v43 = vrot.slane %v199_v36, 2  ;;  %v208_v44 = vadd.f32 %v207_v37, %v206_v29  ;;  %v216_v45 = vrot.slane %v215_v38, 4 }
  0x33   :  { %v193_v46 = vrot.slane %v192_v40, 1  ;;  %v233_v47 = vsel %vm232_vm2, %v176_v39, %v231_v41  ;;  %v267_v3 = vand.u32 2147483648, %v412_v27  ;;  %v258_v7 = vsub.f32 1.0, %v257_v1 }
  0x34   :  { %v185_v48 = vadd.f32 %v184_v42, %v183_v35  ;;  %v201_v49 = vadd.f32 %v200_v43, %v199_v36  ;;  %v209_v50 = vrot.slane %v208_v44, 2  ;;  %v217_v51 = vadd.f32 %v216_v45, %v215_v38 }
  0x35   :  { %v194_v52 = vadd.f32 %v193_v46, %v192_v40  ;;  %vm262_vm9 = vweird.f32 %v355_v61  ;;  %v259_v9 = vmul.f32 %v355_v61, %v258_v7  ;;  %v268_v11 = vor.u32 1.1754944e-38, %v267_v3 }
  0x36   :  { %v202_v53 = vrot.slane %v201_v49, 1  ;;  %v210_v54 = vadd.f32 %v209_v50, %v208_v44  ;;  %v218_v55 = vrot.slane %v217_v51, 2  ;;  %v235_v56 = vsel %vm234_vm3, %v185_v48, %v233_v47  ;;  %vm263_vm10 = vmor %vm261_vm8, %vm262_vm9 }
  0x37   :  { %v237_v57 = vsel %vm236_vm4, %v194_v52, %v235_v56  ;;  %v260_v12 = vadd.f32 %v355_v61, %v259_v9  ;;  %vm266_vm11 = vcmp.eq.f32.partialorder %v265_v2, 8.507059e+37 }
  0x38   :  { %v203_v58 = vadd.f32 %v202_v53, %v201_v49  ;;  %v211_v59 = vrot.slane %v210_v54, 1  ;;  %v219_v60 = vadd.f32 %v218_v55, %v217_v51 }
  0x39   :  { %v264_v13 = vsel %vm263_vm10, %v355_v61, %v260_v12 }
  0x3a   :  { %v212_v62 = vadd.f32 %v211_v59, %v210_v54  ;;  %v220_v63 = vrot.slane %v219_v60, 1  ;;  %v239_v0 = vsel %vm238_vm5, %v203_v58, %v237_v57  ;;  %v269_v14 = vsel %vm266_vm11, %v268_v11, %v264_v13 }
  0x3b   :  { %284 = vpush %v269_v14 }
  0x3c   :  { %v221_v5 = vadd.f32 %v220_v63, %v219_v60  ;;  %v241_v6 = vsel %vm240_vm6, %v212_v62, %v239_v0 }
  0x3e   :  { %v243_v8 = vsel %vm242_vm7, %v221_v5, %v241_v6 }
  0x3f   :  { %v245_v10 = vadd.f32 %v243_v8, %v148_v4 }
  0x41   :  { %246 = vst.msk [vmem:[#allocation2] sm:$0xff] %vm33_vm0, %v245_v10 }
  0x48   :  { %v250_v15 = vld [vmem:[#allocation2] sm:$0xff] }
  0x49   :  { %v251_v27 = vsel %vm33_vm0, %v250_v15, 0.0 }
  0x4a   :  { %252 = vadd.xlane.f32.xlu0 %v251_v27 }
  0x6c   :  { %s285_s0 = spop %284 }
  0x6d   :  { %v273_v19 = vstv %s285_s0 }
  0xbd   :  { %v253_v16 = vpop.xlane.xlu0 %252 }
  0xbe   :  { %v254_v17 = vmul.f32 0.00390625, %v253_v16 }
  0xc0   :  { %356 = vlog2.f32 %v254_v17 }
  0xc6   :  { %v357_v18 = vpop.eup %356 }
  0xc7   :  { %v272_v20 = vmul.f32 0.6931472, %v357_v18 }
  0xc9   :  { %v274_v21 = vmul.f32 %v273_v19, %v272_v20 }
  0xcb   :  { %v275_v22 = vmul.f32 1.442695, %v274_v21 }
  0xcd   :  { %358 = vpow2.f32 %v275_v22 }
  0xd3   :  { %v359_v23 = vpop.eup %358 }
  0xd4   :  { %278 = vst.msk [vmem:[%s461_s2] sm:$0xff] %vm277_vm12, %v359_v23 }
  0xd5   :  { %283 = vsyncpa [#allocation5], 1 }

</bundles_post_ra>
